<compile_context>
chip_gen: v6e
topology: v6e:2x2x1
jax: 0.10.0
libtpu: 0.0.40
codegen_flags: <defaults>
</compile_context>

<pallas_src>
import jax
import jax.numpy as jnp
from jax import lax
from jax.experimental import pallas as pl
from jax.experimental.pallas import tpu as pltpu


def _ensemble_kernel(x_ref, w_ref, b_ref, bd_ref, sel_ref, ones_ref, pad_ref, o_ref):
    # x_ref:   [B, K]       w_ref: [K, NDP]     b_ref:  [1, NDP]
    # bd_ref:  [NDP, NDP]   sel_ref: [B, NDP]   ones_ref: [1, B]   pad_ref: [1, NDP]
    # o_ref:   [B, NDP]
    x = x_ref[...]
    w = w_ref[...]

    # One fused MXU matmul for all N models (padded to lane-dense NDP columns).
    feat = jnp.dot(x, w, preferred_element_type=jnp.float32) + b_ref[...]   # [B, NDP]
    sq = feat * feat                                                        # [B, NDP]

    # Per-model squared row-norms replicated across each model's D-column group:
    #   p[r, j] = sum_{j' in group(j)} sq[r, j'] = ||feat_{group(j)}[r, :]||^2
    p = jnp.dot(sq, bd_ref[...], preferred_element_type=jnp.float32)        # [B, NDP]

    # torch.div(ts, torch.norm(ts, dim=1)) broadcasts the [B] norm along the LAST
    # axis: column j of model i is divided by the norm of row (j mod D). Select
    # that row per column (precomputed sel) and collapse rows with an M=1 MXU pass
    # (no XLU transpose / cross-lane reduce). pad_ref adds 1 in padded columns so
    # rsqrt(0) never occurs (feat there is 0, so the output pad stays 0).
    normsq = jnp.dot(ones_ref[...], p * sel_ref[...],
                     preferred_element_type=jnp.float32) + pad_ref[...]     # [1, NDP]

    # Single lane-dense store for the whole ensemble.
    o_ref[...] = feat * lax.rsqrt(normsq)                                   # [B, NDP]


def ensemble_forward(x_nchw, weights, biases):
    """x_nchw: [B,C,H,W] f32; weights: [N,K,D]; biases: [N,D].

    Returns the fused [B, N*D] slab; model i's normalized features are
    out[:, i*D:(i+1)*D].
    """
    B = x_nchw.shape[0]
    N, K, D = weights.shape
    assert D == B, "PyTorch's tensorNorm broadcast (no keepdim) requires feature_dim == batch"
    x_flat = x_nchw.reshape(B, -1).astype(jnp.float32)            # row-major, == x.view(B,-1)
    assert x_flat.shape[1] == K

    ND = N * D
    NDP = ((ND + 127) // 128) * 128                               # lane-dense padded width

    # --- wrapper-side layout plumbing (all constants, traced once) -------------
    # Concatenate all models along the output dimension, zero-pad to NDP columns.
    w_cat = jnp.transpose(weights, (1, 0, 2)).reshape(K, ND).astype(jnp.float32)
    w_cat = jnp.pad(w_cat, ((0, 0), (0, NDP - ND)))               # [K, NDP]
    b_cat = jnp.pad(biases.reshape(1, ND).astype(jnp.float32),
                    ((0, 0), (0, NDP - ND)))                      # [1, NDP]

    cols = jnp.arange(NDP)
    valid = cols < ND                                             # real (non-pad) columns
    grp = cols // D                                               # model id per column
    bd = ((grp[:, None] == grp[None, :])
          & valid[:, None] & valid[None, :]).astype(jnp.float32)  # [NDP, NDP] block-diag
    rows = jnp.arange(B)
    sel = ((rows[:, None] == (cols[None, :] % D))
           & valid[None, :]).astype(jnp.float32)                  # [B, NDP] row selector
    ones_row = jnp.ones((1, B), jnp.float32)                      # [1, B]
    pad_row = (~valid).astype(jnp.float32)[None, :]               # [1, NDP] (1 in pad cols)

    vmem = pl.BlockSpec(memory_space=pltpu.MemorySpace.VMEM)
    out = pl.pallas_call(
        _ensemble_kernel,
        out_shape=jax.ShapeDtypeStruct((B, NDP), jnp.float32),
        in_specs=[vmem] * 7,
        out_specs=vmem,
    )(x_flat, w_cat, b_cat, bd, sel, ones_row, pad_row)

    return out[:, :ND]                                            # fused slab, pad removed


def _reference(x_nchw, weights, biases):
    """Pure-JAX reference with the exact PyTorch broadcasting semantics."""
    B = x_nchw.shape[0]
    x_flat = x_nchw.reshape(B, -1).astype(jnp.float32)
    outs = []
    for i in range(weights.shape[0]):
        feat = x_flat @ weights[i] + biases[i]                    # [B, D]
        norm = jnp.sqrt(jnp.sum(feat * feat, axis=1))             # [B]  (torch.norm dim=1)
        outs.append(feat / norm)                                  # trailing-axis broadcast
    return outs


if __name__ == "__main__":
    key = jax.random.PRNGKey(0)
    kx, kw, kb = jax.random.split(key, 3)

    B, C, H, W = 8, 4, 16, 16          # small NCHW input
    K = C * H * W                      # 1024
    D = B                              # feature dim == batch (see note above)
    N_MODELS = 3

    x = jax.random.normal(kx, (B, C, H, W), dtype=jnp.float32)
    weights = 0.02 * jax.random.normal(kw, (N_MODELS, K, D), dtype=jnp.float32)
    biases = 0.1 * jax.random.normal(kb, (N_MODELS, D), dtype=jnp.float32)

    slab = ensemble_forward(x, weights, biases)                   # [B, N*D] fused
    slab = jax.block_until_ready(slab)
    assert slab.shape == (B, N_MODELS * D) and slab.dtype == jnp.float32
    assert not jnp.any(jnp.isnan(slab))

    # Per-model views (consumer-side indexing of the fused slab).
    logits = [slab[:, i * D:(i + 1) * D] for i in range(N_MODELS)]
    ref = _reference(x, weights, biases)
    for q, r in zip(logits, ref):
        assert q.shape == (B, D)
        assert jnp.allclose(q, r, atol=1e-5, rtol=1e-5)

    print("KERNEL_OK")
</pallas_src>

<mosaic_0001>
module attributes {stable_mosaic.version = 11 : i64} {
  func.func @_ensemble_kernel(%arg0: memref<8x1024xf32, #tpu.memory_space<vmem>>, %arg1: memref<1024x128xf32, #tpu.memory_space<vmem>>, %arg2: memref<1x128xf32, #tpu.memory_space<vmem>>, %arg3: memref<128x128xf32, #tpu.memory_space<vmem>>, %arg4: memref<8x128xf32, #tpu.memory_space<vmem>>, %arg5: memref<1x8xf32, #tpu.memory_space<vmem>>, %arg6: memref<1x128xf32, #tpu.memory_space<vmem>>, %arg7: memref<8x128xf32, #tpu.memory_space<vmem>>) attributes {dimension_semantics = [], scalar_prefetch = 0 : i64, scratch_operands = 0 : i64, tpu.core_type = #tpu.core_type<tc>} {
    %c0 = arith.constant 0 : index
    %c0_0 = arith.constant 0 : index
    %0 = vector.load %arg0[%c0, %c0_0] : memref<8x1024xf32, #tpu.memory_space<vmem>>, vector<8x1024xf32>
    %c0_1 = arith.constant 0 : index
    %c0_2 = arith.constant 0 : index
    %1 = vector.load %arg1[%c0_1, %c0_2] : memref<1024x128xf32, #tpu.memory_space<vmem>>, vector<1024x128xf32>
    %cst = arith.constant dense<0.000000e+00> : vector<8x128xf32>
    %2 = tpu.matmul %0, %1, %cst {dimension_numbers = #tpu.dot_dimension_numbers<[1], [0], [0], [1], [0, 0, 1, 1], [], []>} : vector<8x1024xf32>, vector<1024x128xf32>, vector<8x128xf32> -> vector<8x128xf32>
    %c0_3 = arith.constant 0 : index
    %c0_4 = arith.constant 0 : index
    %3 = vector.load %arg2[%c0_3, %c0_4] : memref<1x128xf32, #tpu.memory_space<vmem>>, vector<1x128xf32>
    %4 = vector.broadcast %3 : vector<1x128xf32> to vector<8x128xf32>
    %5 = arith.addf %2, %4 : vector<8x128xf32>
    %6 = arith.mulf %5, %5 : vector<8x128xf32>
    %c0_5 = arith.constant 0 : index
    %c0_6 = arith.constant 0 : index
    %7 = vector.load %arg3[%c0_5, %c0_6] : memref<128x128xf32, #tpu.memory_space<vmem>>, vector<128x128xf32>
    %cst_7 = arith.constant dense<0.000000e+00> : vector<8x128xf32>
    %8 = tpu.matmul %6, %7, %cst_7 {dimension_numbers = #tpu.dot_dimension_numbers<[1], [0], [0], [1], [0, 0, 1, 1], [], []>} : vector<8x128xf32>, vector<128x128xf32>, vector<8x128xf32> -> vector<8x128xf32>
    %c0_8 = arith.constant 0 : index
    %c0_9 = arith.constant 0 : index
    %9 = vector.load %arg5[%c0_8, %c0_9] : memref<1x8xf32, #tpu.memory_space<vmem>>, vector<1x8xf32>
    %c0_10 = arith.constant 0 : index
    %c0_11 = arith.constant 0 : index
    %10 = vector.load %arg4[%c0_10, %c0_11] : memref<8x128xf32, #tpu.memory_space<vmem>>, vector<8x128xf32>
    %11 = arith.mulf %8, %10 : vector<8x128xf32>
    %cst_12 = arith.constant dense<0.000000e+00> : vector<1x128xf32>
    %12 = tpu.matmul %9, %11, %cst_12 {dimension_numbers = #tpu.dot_dimension_numbers<[1], [0], [0], [1], [0, 0, 1, 1], [], []>} : vector<1x8xf32>, vector<8x128xf32>, vector<1x128xf32> -> vector<1x128xf32>
    %c0_13 = arith.constant 0 : index
    %c0_14 = arith.constant 0 : index
    %13 = vector.load %arg6[%c0_13, %c0_14] : memref<1x128xf32, #tpu.memory_space<vmem>>, vector<1x128xf32>
    %14 = arith.addf %12, %13 : vector<1x128xf32>
    %15 = math.rsqrt %14 : vector<1x128xf32>
    %16 = vector.broadcast %15 : vector<1x128xf32> to vector<8x128xf32>
    %17 = arith.mulf %5, %16 : vector<8x128xf32>
    %c0_15 = arith.constant 0 : index
    %c0_16 = arith.constant 0 : index
    %18 = vector.load %arg7[%c0_15, %c0_16] : memref<8x128xf32, #tpu.memory_space<vmem>>, vector<8x128xf32>
    tpu.vector_store %arg7[%c0_15, %c0_16], %17 {strides = array<i32>} : memref<8x128xf32, #tpu.memory_space<vmem>>, vector<8x128xf32>,
    return
  }
}

</mosaic_0001>

<bundles_post_ra>
// kernel: tpu_custom_call.1
= control target key start
LH: loop header
LB: loop body
LE: loop exit
PB: predicated region body
PF: predicated region fallthrough
CT: control target
= control target key end

     0   :  { %12 = vsyncpa [#allocation3], 0  ;;  %s1083_s0 = inlined_call_operand.hbm [shape: f32[8,1024], index: 0, kind: input, shape index: {}]   ;;  %s1084_s1 = inlined_call_operand.hbm [shape: f32[1024,128], index: 1, kind: input, shape index: {}]   ;;  %s1085_s2 = inlined_call_operand.vmem [shape: f32[1,128], index: 2, kind: input, shape index: {}]   ;;  %s1086_s3 = inlined_call_operand.hbm [shape: f32[128,128], index: 3, kind: input, shape index: {}]   ;;  %s1087_s4 = inlined_call_operand.hbm [shape: f32[8,128], index: 4, kind: input, shape index: {}]   ;;  %s1088_s5 = inlined_call_operand.vmem [shape: f32[1,8], index: 5, kind: input, shape index: {}]   ;;  %s1089_s6 = inlined_call_operand.vmem [shape: f32[1,128], index: 6, kind: input, shape index: {}]   ;;  %s1090_s7 = inlined_call_operand.hbm [shape: f32[8,128], index: 7, kind: output, shape index: {}]  }
   0x1   :  { %13 = vsyncpa [#allocation6], 0 }
   0x2   :  { %14 = vsyncpa [#allocation9], 0 }
   0x3   :  { %15 = vsyncpa [#allocation4], 0  ;;  %s1010_s24 = smov [#allocation5]  }
   0x4   :  { %s31_s25 = sshll.u32 %s1010_s24, 4  ;;  %s32_s25 = int_to_ptr.vmem [resolvable:$true] %s31_s25 }
   0x5   :  { %s910_s26 = scalar_lea.vmem %s32_s25, 16384  ;;  %p915_p1 = scmp.lt.s32.totalorder %s32_s25, %s32_s25 }
   0x6   :  { %p911_p0 = scmp.ne.s32.totalorder %s32_s25, %s910_s26  ;;  %p916_p2 = scmp.lt.s32.totalorder %s910_s26, %s910_s26 }
   0x8   :  { %p917_p3 = por %p916_p2, %p915_p1 }
   0xa   :  { %p918_p4 = pnand %p917_p3, %p911_p0 }
   0xc   :  { %921 = shalt.err (!%p918_p4)
}
   0xd   :  { %s1011_s27 = smov 128   ;;  %s1012_s28 = smov 8  }
   0xe   :  { %37 = dma.hbm_to_vmem [thread:$0]  %s1084_s1, 16384, %s32_s25, [#allocation6], %s1011_s27, %s1011_s27, %s1012_s28  }
   0xf   :  { %s1013_s8 = smov [#allocation2]   ;;  %s1014_s10 = smov [#allocation7]  }
  0x10   :  { %s22_s9 = sshll.u32 %s1013_s8, 4  ;;  %s45_s11 = sshll.u32 %s1014_s10, 4  ;;  %s23_s9 = int_to_ptr.vmem [resolvable:$true] %s22_s9  ;;  %s46_s11 = int_to_ptr.vmem [resolvable:$true] %s45_s11 }
  0x11   :  { %s930_s12 = scalar_lea.vmem %s23_s9, 1024  ;;  %p935_p6 = scmp.lt.s32.totalorder %s23_s9, %s23_s9 }
  0x12   :  { %p931_p5 = scmp.ne.s32.totalorder %s23_s9, %s930_s12  ;;  %p936_p7 = scmp.lt.s32.totalorder %s930_s12, %s930_s12 }
  0x14   :  { %p937_p8 = por %p936_p7, %p935_p6 }
  0x16   :  { %p938_p9 = pnand %p937_p8, %p931_p5 }
  0x18   :  { %941 = shalt.err (!%p938_p9)
}
  0x19   :  { %25 = dma.hbm_to_vmem [thread:$0]  %s1083_s0, 1024, %s23_s9, [#allocation3]  }
  0x1a   :  { %s950_s15 = scalar_lea.vmem %s46_s11, 2048  ;;  %p955_p11 = scmp.lt.s32.totalorder %s46_s11, %s46_s11 }
  0x1b   :  { %p951_p10 = scmp.ne.s32.totalorder %s46_s11, %s950_s15  ;;  %p956_p12 = scmp.lt.s32.totalorder %s950_s15, %s950_s15 }
  0x1d   :  { %p957_p13 = por %p956_p12, %p955_p11 }
  0x1f   :  { %p958_p0 = pnand %p957_p13, %p951_p10 }
  0x21   :  { %961 = shalt.err (!%p958_p0)
}
  0x22   :  { %51 = dma.hbm_to_vmem [thread:$0]  %s1086_s3, 2048, %s46_s11, [#allocation6], %s1011_s27, %s1011_s27, %s1012_s28  }
  0x23   :  { %s1015_s17 = smov [#allocation8]  }
  0x24   :  { %s58_s18 = sshll.u32 %s1015_s17, 4  ;;  %s59_s18 = int_to_ptr.vmem [resolvable:$true] %s58_s18 }
  0x25   :  { %s970_s19 = scalar_lea.vmem %s59_s18, 128  ;;  %p975_p2 = scmp.lt.s32.totalorder %s59_s18, %s59_s18 }
  0x26   :  { %p971_p1 = scmp.ne.s32.totalorder %s59_s18, %s970_s19  ;;  %p976_p3 = scmp.lt.s32.totalorder %s970_s19, %s970_s19 }
  0x28   :  { %p977_p4 = por %p976_p3, %p975_p2 }
  0x2a   :  { %p978_p5 = pnand %p977_p4, %p971_p1 }
  0x2c   :  { %981 = shalt.err (!%p978_p5)
}
  0x2d   :  { %61 = dma.hbm_to_vmem [thread:$0]  %s1087_s4, 128, %s59_s18, [#allocation9]  }
  0x2e   :  { %1002 = dma.done.wait [#allocation3], 1024  }
  0x2f   :  { %1003 = vsyncadd [#allocation3], 4294966272 }
  0x30   :  { %1004 = dma.done.wait [#allocation6], 18432  }
  0x31   :  { %1005 = vsyncadd [#allocation6], 4294948864 }
  0x32   :  { %1006 = dma.done.wait [#allocation9], 128  }
  0x33   :  { %1007 = vsyncadd [#allocation9], 4294967168  ;;  %v117_v0 = vld [vmem:[#allocation5 + $0xf8] sm:$0xff]  ;;  %v116_v4 = vld [vmem:[#allocation5 + $0xf0] sm:$0xff]  ;;  %vm1017_vm0 = vmmov 0   ;;  %vm592_vm1 = vcmask 64512  }
  0x34   :  { %v149_v1 = vld [vmem:[#allocation5 + $0x1f8] sm:$0xff]  ;;  %692 = vmatprep.subr.mxu0 %v117_v0  ;;  %v148_v5 = vld [vmem:[#allocation5 + $0x1f0] sm:$0xff]  ;;  %v115_v8 = vld [vmem:[#allocation5 + $0xe8] sm:$0xff]  ;;  %s1018_s24 = smov [#allocation10]  }
  0x35   :  { %v101_v2 = vld [vmem:[#allocation5 + $0x78] sm:$0xff]  ;;  %727 = vmatprep.subr.mxu1 %v149_v1  ;;  %v100_v6 = vld [vmem:[#allocation5 + $0x70] sm:$0xff]  ;;  %v147_v9 = vld [vmem:[#allocation5 + $0x1e8] sm:$0xff]  ;;  %s679_s25 = sshll.u32 %s1018_s24, 4  ;;  %s680_s25 = int_to_ptr.vmem [resolvable:$true] %s679_s25 }
  0x36   :  { %v133_v3 = vld [vmem:[#allocation5 + $0x178] sm:$0xff]  ;;  %693 = vmatpush3.msra.mxu0 %v101_v2  ;;  %v132_v7 = vld [vmem:[#allocation5 + $0x170] sm:$0xff]  ;;  %v99_v10 = vld [vmem:[#allocation5 + $0x68] sm:$0xff]  ;;  %p987_p7 = scmp.lt.s32.totalorder %s680_s25, %s680_s25 }
  0x37   :  { %728 = vmatpush3.msra.mxu1 %v133_v3  ;;  %694 = vmatprep.subr.mxu0 %v116_v4  ;;  %v131_v11 = vld [vmem:[#allocation5 + $0x168] sm:$0xff]  ;;  %v114_v12 = vld [vmem:[#allocation5 + $0xe0] sm:$0xff]  ;;  %v113_v16 = vld [vmem:[#allocation5 + $0xd8] sm:$0xff] }
  0x38   :  { %729 = vmatprep.subr.mxu1 %v148_v5  ;;  %695 = vmatpush3.msra.mxu0 %v100_v6  ;;  %v146_v13 = vld [vmem:[#allocation5 + $0x1e0] sm:$0xff]  ;;  %v145_v17 = vld [vmem:[#allocation5 + $0x1d8] sm:$0xff]  ;;  %v112_v20 = vld [vmem:[#allocation5 + $0xd0] sm:$0xff] }
  0x39   :  { %730 = vmatpush3.msra.mxu1 %v132_v7  ;;  %696 = vmatprep.subr.mxu0 %v115_v8  ;;  %v98_v14 = vld [vmem:[#allocation5 + $0x60] sm:$0xff]  ;;  %v97_v18 = vld [vmem:[#allocation5 + $0x58] sm:$0xff]  ;;  %v144_v21 = vld [vmem:[#allocation5 + $0x1d0] sm:$0xff] }
  0x3a   :  { %731 = vmatprep.subr.mxu1 %v147_v9  ;;  %v130_v15 = vld [vmem:[#allocation5 + $0x160] sm:$0xff]  ;;  %697 = vmatpush3.msra.mxu0 %v99_v10  ;;  %v129_v19 = vld [vmem:[#allocation5 + $0x158] sm:$0xff]  ;;  %v96_v22 = vld [vmem:[#allocation5 + $0x50] sm:$0xff] }
  0x3b   :  { %732 = vmatpush3.msra.mxu1 %v131_v11  ;;  %698 = vmatprep.subr.mxu0 %v114_v12  ;;  %v128_v23 = vld [vmem:[#allocation5 + $0x150] sm:$0xff]  ;;  %v111_v24 = vld [vmem:[#allocation5 + $0xc8] sm:$0xff]  ;;  %v110_v28 = vld [vmem:[#allocation5 + $0xc0] sm:$0xff] }
  0x3c   :  { %733 = vmatprep.subr.mxu1 %v146_v13  ;;  %699 = vmatpush3.msra.mxu0 %v98_v14  ;;  %v143_v25 = vld [vmem:[#allocation5 + $0x1c8] sm:$0xff]  ;;  %v142_v29 = vld [vmem:[#allocation5 + $0x1c0] sm:$0xff]  ;;  %v109_v32 = vld [vmem:[#allocation5 + $0xb8] sm:$0xff] }
  0x3d   :  { %734 = vmatpush3.msra.mxu1 %v130_v15  ;;  %700 = vmatprep.subr.mxu0 %v113_v16  ;;  %v95_v26 = vld [vmem:[#allocation5 + $0x48] sm:$0xff]  ;;  %v94_v30 = vld [vmem:[#allocation5 + $0x40] sm:$0xff]  ;;  %v141_v33 = vld [vmem:[#allocation5 + $0x1b8] sm:$0xff] }
  0x3e   :  { %735 = vmatprep.subr.mxu1 %v145_v17  ;;  %701 = vmatpush3.msra.mxu0 %v97_v18  ;;  %v127_v27 = vld [vmem:[#allocation5 + $0x148] sm:$0xff]  ;;  %v126_v31 = vld [vmem:[#allocation5 + $0x140] sm:$0xff]  ;;  %v93_v34 = vld [vmem:[#allocation5 + $0x38] sm:$0xff] }
  0x3f   :  { %736 = vmatpush3.msra.mxu1 %v129_v19  ;;  %702 = vmatprep.subr.mxu0 %v112_v20  ;;  %v125_v35 = vld [vmem:[#allocation5 + $0x138] sm:$0xff]  ;;  %v108_v36 = vld [vmem:[#allocation5 + $0xb0] sm:$0xff]  ;;  %v107_v40 = vld [vmem:[#allocation5 + $0xa8] sm:$0xff] }
  0x40   :  { %737 = vmatprep.subr.mxu1 %v144_v21  ;;  %703 = vmatpush3.msra.mxu0 %v96_v22  ;;  %v140_v37 = vld [vmem:[#allocation5 + $0x1b0] sm:$0xff]  ;;  %v139_v41 = vld [vmem:[#allocation5 + $0x1a8] sm:$0xff]  ;;  %v106_v44 = vld [vmem:[#allocation5 + $0xa0] sm:$0xff] }
  0x41   :  { %738 = vmatpush3.msra.mxu1 %v128_v23  ;;  %704 = vmatprep.subr.mxu0 %v111_v24  ;;  %v92_v38 = vld [vmem:[#allocation5 + $0x30] sm:$0xff]  ;;  %v91_v42 = vld [vmem:[#allocation5 + $0x28] sm:$0xff]  ;;  %v138_v45 = vld [vmem:[#allocation5 + $0x1a0] sm:$0xff] }
  0x42   :  { %739 = vmatprep.subr.mxu1 %v143_v25  ;;  %705 = vmatpush3.msra.mxu0 %v95_v26  ;;  %v124_v39 = vld [vmem:[#allocation5 + $0x130] sm:$0xff]  ;;  %v123_v43 = vld [vmem:[#allocation5 + $0x128] sm:$0xff]  ;;  %v90_v46 = vld [vmem:[#allocation5 + $0x20] sm:$0xff] }
  0x43   :  { %740 = vmatpush3.msra.mxu1 %v127_v27  ;;  %706 = vmatprep.subr.mxu0 %v110_v28  ;;  %v122_v47 = vld [vmem:[#allocation5 + $0x120] sm:$0xff]  ;;  %v105_v48 = vld [vmem:[#allocation5 + $0x98] sm:$0xff]  ;;  %v104_v52 = vld [vmem:[#allocation5 + $0x90] sm:$0xff] }
  0x44   :  { %741 = vmatprep.subr.mxu1 %v142_v29  ;;  %707 = vmatpush3.msra.mxu0 %v94_v30  ;;  %v137_v49 = vld [vmem:[#allocation5 + $0x198] sm:$0xff]  ;;  %v136_v53 = vld [vmem:[#allocation5 + $0x190] sm:$0xff]  ;;  %v103_v56 = vld [vmem:[#allocation5 + $0x88] sm:$0xff] }
  0x45   :  { %742 = vmatpush3.msra.mxu1 %v126_v31  ;;  %708 = vmatprep.subr.mxu0 %v109_v32  ;;  %v89_v50 = vld [vmem:[#allocation5 + $0x18] sm:$0xff]  ;;  %v88_v54 = vld [vmem:[#allocation5 + $0x10] sm:$0xff]  ;;  %v135_v57 = vld [vmem:[#allocation5 + $0x188] sm:$0xff] }
  0x46   :  { %743 = vmatprep.subr.mxu1 %v141_v33  ;;  %709 = vmatpush3.msra.mxu0 %v93_v34  ;;  %v121_v51 = vld [vmem:[#allocation5 + $0x118] sm:$0xff]  ;;  %v120_v55 = vld [vmem:[#allocation5 + $0x110] sm:$0xff]  ;;  %v87_v58 = vld [vmem:[#allocation5 + $0x8] sm:$0xff] }
  0x47   :  { %744 = vmatpush3.msra.mxu1 %v125_v35  ;;  %710 = vmatprep.subr.mxu0 %v108_v36  ;;  %v119_v59 = vld [vmem:[#allocation5 + $0x108] sm:$0xff]  ;;  %v102_v60 = vld [vmem:[#allocation5 + $0x80] sm:$0xff]  ;;  %v81_v2 = vld [vmem:[#allocation2 + $0x18] sm:$0xff] }
  0x48   :  { %745 = vmatprep.subr.mxu1 %v140_v37  ;;  %711 = vmatpush3.msra.mxu0 %v92_v38  ;;  %v134_v61 = vld [vmem:[#allocation5 + $0x180] sm:$0xff]  ;;  %v79_v63 = vld [vmem:[#allocation2 + $0x8] sm:$0xff]  ;;  %v181_v3 = vld [vmem:[#allocation5 + $0x2f8] sm:$0xff] }
  0x49   :  { %746 = vmatpush3.msra.mxu1 %v124_v39  ;;  %712 = vmatprep.subr.mxu0 %v107_v40  ;;  %v86_v62 = vld [vmem:[#allocation5] sm:$0xff]  ;;  %v213_v4 = vld [vmem:[#allocation5 + $0x3f8] sm:$0xff]  ;;  %v80_v5 = vld [vmem:[#allocation2 + $0x10] sm:$0xff] }
  0x4a   :  { %747 = vmatprep.subr.mxu1 %v139_v41  ;;  %713 = vmatpush3.msra.mxu0 %v91_v42  ;;  %v118_v0 = vld [vmem:[#allocation5 + $0x100] sm:$0xff]  ;;  %v165_v6 = vld [vmem:[#allocation5 + $0x278] sm:$0xff]  ;;  %v180_v8 = vld [vmem:[#allocation5 + $0x2f0] sm:$0xff] }
  0x4b   :  { %748 = vmatpush3.msra.mxu1 %v123_v43  ;;  %714 = vmatprep.subr.mxu0 %v106_v44  ;;  %v78_v1 = vld [vmem:[#allocation2] sm:$0xff]  ;;  %v197_v7 = vld [vmem:[#allocation5 + $0x378] sm:$0xff]  ;;  %v212_v9 = vld [vmem:[#allocation5 + $0x3f0] sm:$0xff] }
  0x4c   :  { %749 = vmatprep.subr.mxu1 %v138_v45  ;;  %715 = vmatpush3.msra.mxu0 %v90_v46  ;;  %v164_v10 = vld [vmem:[#allocation5 + $0x270] sm:$0xff]  ;;  %v179_v12 = vld [vmem:[#allocation5 + $0x2e8] sm:$0xff]  ;;  %v178_v16 = vld [vmem:[#allocation5 + $0x2e0] sm:$0xff] }
  0x4d   :  { %750 = vmatpush3.msra.mxu1 %v122_v47  ;;  %716 = vmatprep.subr.mxu0 %v105_v48  ;;  %v196_v11 = vld [vmem:[#allocation5 + $0x370] sm:$0xff]  ;;  %v211_v13 = vld [vmem:[#allocation5 + $0x3e8] sm:$0xff]  ;;  %v210_v17 = vld [vmem:[#allocation5 + $0x3e0] sm:$0xff] }
  0x4e   :  { %751 = vmatprep.subr.mxu1 %v137_v49  ;;  %717 = vmatpush3.msra.mxu0 %v89_v50  ;;  %v163_v14 = vld [vmem:[#allocation5 + $0x268] sm:$0xff]  ;;  %v162_v18 = vld [vmem:[#allocation5 + $0x260] sm:$0xff]  ;;  %v177_v20 = vld [vmem:[#allocation5 + $0x2d8] sm:$0xff] }
  0x4f   :  { %752 = vmatpush3.msra.mxu1 %v121_v51  ;;  %718 = vmatprep.subr.mxu0 %v104_v52  ;;  %v195_v15 = vld [vmem:[#allocation5 + $0x368] sm:$0xff]  ;;  %v194_v19 = vld [vmem:[#allocation5 + $0x360] sm:$0xff]  ;;  %v209_v21 = vld [vmem:[#allocation5 + $0x3d8] sm:$0xff] }
  0x50   :  { %753 = vmatprep.subr.mxu1 %v136_v53  ;;  %719 = vmatpush3.msra.mxu0 %v88_v54  ;;  %v161_v22 = vld [vmem:[#allocation5 + $0x258] sm:$0xff]  ;;  %v176_v24 = vld [vmem:[#allocation5 + $0x2d0] sm:$0xff]  ;;  %v175_v28 = vld [vmem:[#allocation5 + $0x2c8] sm:$0xff] }
  0x51   :  { %754 = vmatpush3.msra.mxu1 %v120_v55  ;;  %720 = vmatprep.subr.mxu0 %v103_v56  ;;  %v193_v23 = vld [vmem:[#allocation5 + $0x358] sm:$0xff]  ;;  %v208_v25 = vld [vmem:[#allocation5 + $0x3d0] sm:$0xff]  ;;  %v207_v29 = vld [vmem:[#allocation5 + $0x3c8] sm:$0xff] }
  0x52   :  { %755 = vmatprep.subr.mxu1 %v135_v57  ;;  %721 = vmatpush3.msra.mxu0 %v87_v58  ;;  %v160_v26 = vld [vmem:[#allocation5 + $0x250] sm:$0xff]  ;;  %v159_v30 = vld [vmem:[#allocation5 + $0x248] sm:$0xff]  ;;  %v174_v32 = vld [vmem:[#allocation5 + $0x2c0] sm:$0xff] }
  0x53   :  { %756 = vmatpush3.msra.mxu1 %v119_v59  ;;  %722 = vmatprep.subr.mxu0 %v102_v60  ;;  %v192_v27 = vld [vmem:[#allocation5 + $0x350] sm:$0xff]  ;;  %v191_v31 = vld [vmem:[#allocation5 + $0x348] sm:$0xff]  ;;  %v206_v33 = vld [vmem:[#allocation5 + $0x3c0] sm:$0xff] }
  0x54   :  { %757 = vmatprep.subr.mxu1 %v134_v61  ;;  %723 = vmatpush3.msra.mxu0 %v86_v62  ;;  %v158_v34 = vld [vmem:[#allocation5 + $0x240] sm:$0xff]  ;;  %v173_v36 = vld [vmem:[#allocation5 + $0x2b8] sm:$0xff]  ;;  %v172_v40 = vld [vmem:[#allocation5 + $0x2b0] sm:$0xff] }
  0x55   :  { %285 = vmatprep.mubr.f32.mxu0 %v79_v63  ;;  %758 = vmatpush3.msra.mxu1 %v118_v0  ;;  %v190_v35 = vld [vmem:[#allocation5 + $0x340] sm:$0xff]  ;;  %v205_v37 = vld [vmem:[#allocation5 + $0x3b8] sm:$0xff]  ;;  %v204_v41 = vld [vmem:[#allocation5 + $0x3b0] sm:$0xff] }
  0x56   :  { %286 = vmatmul.mubr.f32.vlgmr.msra.gmra.mxu0 %v78_v1  ;;  %355 = vmatprep.mubr.f32.mxu1 %v81_v2  ;;  %v157_v38 = vld [vmem:[#allocation5 + $0x238] sm:$0xff]  ;;  %v156_v42 = vld [vmem:[#allocation5 + $0x230] sm:$0xff]  ;;  %v171_v44 = vld [vmem:[#allocation5 + $0x2a8] sm:$0xff] }
  0x57   :  { %762 = vmatprep.subr.mxu0 %v181_v3  ;;  %797 = vmatprep.subr.mxu1 %v213_v4  ;;  %v189_v39 = vld [vmem:[#allocation5 + $0x338] sm:$0xff]  ;;  %v188_v43 = vld [vmem:[#allocation5 + $0x330] sm:$0xff]  ;;  %v203_v45 = vld [vmem:[#allocation5 + $0x3a8] sm:$0xff] }
  0x58   :  { %356 = vmatmul.mubr.f32.vlgmr.msra.gmra.mxu1 %v80_v5  ;;  %763 = vmatpush3.msra.mxu0 %v165_v6  ;;  %v155_v46 = vld [vmem:[#allocation5 + $0x228] sm:$0xff]  ;;  %v170_v48 = vld [vmem:[#allocation5 + $0x2a0] sm:$0xff]  ;;  %v169_v52 = vld [vmem:[#allocation5 + $0x298] sm:$0xff] }
  0x59   :  { %798 = vmatpush3.msra.mxu1 %v197_v7  ;;  %764 = vmatprep.subr.mxu0 %v180_v8  ;;  %v187_v47 = vld [vmem:[#allocation5 + $0x328] sm:$0xff]  ;;  %v202_v49 = vld [vmem:[#allocation5 + $0x3a0] sm:$0xff]  ;;  %v201_v53 = vld [vmem:[#allocation5 + $0x398] sm:$0xff] }
  0x5a   :  { %799 = vmatprep.subr.mxu1 %v212_v9  ;;  %765 = vmatpush3.msra.mxu0 %v164_v10  ;;  %v154_v50 = vld [vmem:[#allocation5 + $0x220] sm:$0xff]  ;;  %v153_v54 = vld [vmem:[#allocation5 + $0x218] sm:$0xff]  ;;  %v168_v56 = vld [vmem:[#allocation5 + $0x290] sm:$0xff]  ;;  %v1016_v9 = vmov 0.0  }
  0x5b   :  { %800 = vmatpush3.msra.mxu1 %v196_v11  ;;  %766 = vmatprep.subr.mxu0 %v179_v12  ;;  %v186_v51 = vld [vmem:[#allocation5 + $0x320] sm:$0xff]  ;;  %v185_v55 = vld [vmem:[#allocation5 + $0x318] sm:$0xff]  ;;  %v200_v57 = vld [vmem:[#allocation5 + $0x390] sm:$0xff] }
  0x5c   :  { %801 = vmatprep.subr.mxu1 %v211_v13  ;;  %767 = vmatpush3.msra.mxu0 %v163_v14  ;;  %v152_v58 = vld [vmem:[#allocation5 + $0x210] sm:$0xff]  ;;  %v167_v60 = vld [vmem:[#allocation5 + $0x288] sm:$0xff]  ;;  %v166_v0 = vld [vmem:[#allocation5 + $0x280] sm:$0xff] }
  0x5d   :  { %802 = vmatpush3.msra.mxu1 %v195_v15  ;;  %768 = vmatprep.subr.mxu0 %v178_v16  ;;  %v184_v59 = vld [vmem:[#allocation5 + $0x310] sm:$0xff]  ;;  %v199_v61 = vld [vmem:[#allocation5 + $0x388] sm:$0xff]  ;;  %v198_v1 = vld [vmem:[#allocation5 + $0x380] sm:$0xff] }
  0x5e   :  { %803 = vmatprep.subr.mxu1 %v210_v17  ;;  %769 = vmatpush3.msra.mxu0 %v162_v18  ;;  %v151_v62 = vld [vmem:[#allocation5 + $0x208] sm:$0xff]  ;;  %v150_v2 = vld [vmem:[#allocation5 + $0x200] sm:$0xff]  ;;  %v85_v5 = vld [vmem:[#allocation2 + $0x38] sm:$0xff] }
  0x5f   :  { %804 = vmatpush3.msra.mxu1 %v194_v19  ;;  %770 = vmatprep.subr.mxu0 %v177_v20  ;;  %v183_v63 = vld [vmem:[#allocation5 + $0x308] sm:$0xff]  ;;  %v182_v4 = vld [vmem:[#allocation5 + $0x300] sm:$0xff]  ;;  %v84_v7 = vld [vmem:[#allocation2 + $0x30] sm:$0xff] }
  0x60   :  { %805 = vmatprep.subr.mxu1 %v209_v21  ;;  %771 = vmatpush3.msra.mxu0 %v161_v22  ;;  %v83_v3 = vld [vmem:[#allocation2 + $0x28] sm:$0xff]  ;;  %v82_v6 = vld [vmem:[#allocation2 + $0x20] sm:$0xff]  ;;  %v517_v8 = vld [vmem:[#allocation7 + $0x78] sm:$0xff] }
  0x61   :  { %806 = vmatpush3.msra.mxu1 %v193_v23  ;;  %772 = vmatprep.subr.mxu0 %v176_v24  ;;  %v516_v10 = vld [vmem:[#allocation7 + $0x70] sm:$0xff]  ;;  %v515_v11 = vld [vmem:[#allocation7 + $0x68] sm:$0xff]  ;;  %v514_v12 = vld [vmem:[#allocation7 + $0x60] sm:$0xff] }
  0x62   :  { %807 = vmatprep.subr.mxu1 %v208_v25  ;;  %773 = vmatpush3.msra.mxu0 %v160_v26  ;;  %v513_v13 = vld [vmem:[#allocation7 + $0x58] sm:$0xff]  ;;  %v512_v14 = vld [vmem:[#allocation7 + $0x50] sm:$0xff]  ;;  %v511_v15 = vld [vmem:[#allocation7 + $0x48] sm:$0xff] }
  0x63   :  { %808 = vmatpush3.msra.mxu1 %v192_v27  ;;  %774 = vmatprep.subr.mxu0 %v175_v28  ;;  %v510_v16 = vld [vmem:[#allocation7 + $0x40] sm:$0xff]  ;;  %v509_v17 = vld [vmem:[#allocation7 + $0x38] sm:$0xff]  ;;  %v508_v18 = vld [vmem:[#allocation7 + $0x30] sm:$0xff] }
  0x64   :  { %809 = vmatprep.subr.mxu1 %v207_v29  ;;  %775 = vmatpush3.msra.mxu0 %v159_v30  ;;  %v507_v19 = vld [vmem:[#allocation7 + $0x28] sm:$0xff]  ;;  %v506_v20 = vld [vmem:[#allocation7 + $0x20] sm:$0xff]  ;;  %v505_v21 = vld [vmem:[#allocation7 + $0x18] sm:$0xff] }
  0x65   :  { %810 = vmatpush3.msra.mxu1 %v191_v31  ;;  %776 = vmatprep.subr.mxu0 %v174_v32  ;;  %v504_v22 = vld [vmem:[#allocation7 + $0x10] sm:$0xff]  ;;  %v503_v23 = vld [vmem:[#allocation7 + $0x8] sm:$0xff]  ;;  %v502_v24 = vld [vmem:[#allocation7] sm:$0xff] }
  0x66   :  { %811 = vmatprep.subr.mxu1 %v206_v33  ;;  %777 = vmatpush3.msra.mxu0 %v158_v34  ;;  %v690_v29 = vld [vmem:[%s1085_s2] ss:$0 sm:$0xff] }
  0x67   :  { %812 = vmatpush3.msra.mxu1 %v190_v35  ;;  %778 = vmatprep.subr.mxu0 %v173_v36 }
  0x68   :  { %813 = vmatprep.subr.mxu1 %v205_v37  ;;  %779 = vmatpush3.msra.mxu0 %v157_v38 }
  0x69   :  { %814 = vmatpush3.msra.mxu1 %v189_v39  ;;  %780 = vmatprep.subr.mxu0 %v172_v40 }
  0x6a   :  { %815 = vmatprep.subr.mxu1 %v204_v41  ;;  %781 = vmatpush3.msra.mxu0 %v156_v42 }
  0x6b   :  { %816 = vmatpush3.msra.mxu1 %v188_v43  ;;  %782 = vmatprep.subr.mxu0 %v171_v44  ;;  %v589_v43 = vld [vmem:[#allocation8] sm:$0xff] }
  0x6c   :  { %817 = vmatprep.subr.mxu1 %v203_v45  ;;  %783 = vmatpush3.msra.mxu0 %v155_v46  ;;  %v588_v46 = vld [vmem:[%s1088_s5] sm:$0x1]  ;;  %s982_s5 = scalar_lea.vmem %s680_s25, 128 }
  0x6d   :  { %818 = vmatpush3.msra.mxu1 %v187_v47  ;;  %784 = vmatprep.subr.mxu0 %v170_v48  ;;  %v591_v48 = vld [vmem:[%s1089_s6] sm:$0x1]  ;;  %p983_p6 = scmp.ne.s32.totalorder %s680_s25, %s982_s5  ;;  %p988_p8 = scmp.lt.s32.totalorder %s982_s5, %s982_s5 }
  0x6e   :  { %819 = vmatprep.subr.mxu1 %v202_v49  ;;  %785 = vmatpush3.msra.mxu0 %v154_v50 }
  0x6f   :  { %820 = vmatpush3.msra.mxu1 %v186_v51  ;;  %786 = vmatprep.subr.mxu0 %v169_v52  ;;  %v667_v52 = vlaneseq  ;;  %p989_p9 = por %p988_p8, %p987_p7 }
  0x70   :  { %821 = vmatprep.subr.mxu1 %v201_v53  ;;  %787 = vmatpush3.msra.mxu0 %v153_v54 }
  0x71   :  { %822 = vmatpush3.msra.mxu1 %v185_v55  ;;  %788 = vmatprep.subr.mxu0 %v168_v56  ;;  %v668_v53 = vshrl.u32 %v667_v52, 7  ;;  %p990_p10 = pnand %p989_p9, %p983_p6 }
  0x72   :  { %823 = vmatprep.subr.mxu1 %v200_v57  ;;  %789 = vmatpush3.msra.mxu0 %v152_v58 }
  0x73   :  { %824 = vmatpush3.msra.mxu1 %v184_v59  ;;  %790 = vmatprep.subr.mxu0 %v167_v60  ;;  %v669_v54 = vsub.s32 0, %v668_v53 }
  0x74   :  { %825 = vmatprep.subr.mxu1 %v199_v61  ;;  %791 = vmatpush3.msra.mxu0 %v151_v62 }
  0x75   :  { %826 = vmatpush3.msra.mxu1 %v183_v63  ;;  %792 = vmatprep.subr.mxu0 %v166_v0 }
  0x76   :  { %827 = vmatprep.subr.mxu1 %v198_v1  ;;  %793 = vmatpush3.msra.mxu0 %v150_v2 }
  0x77   :  { %425 = vmatprep.mubr.f32.mxu0 %v83_v3  ;;  %828 = vmatpush3.msra.mxu1 %v182_v4 }
  0x78   :  { %495 = vmatprep.mubr.f32.mxu1 %v85_v5  ;;  %426 = vmatmul.mubr.f32.vlgmr.msra.gmra.mxu0 %v82_v6 }
  0x79   :  { %496 = vmatmul.mubr.f32.vlgmr.msra.gmra.mxu1 %v84_v7  ;;  %851 = vmatprep.subr.mxu0 %v1016_v9 }
  0x7a   :  { %886 = vmatprep.subr.mxu1 %v1016_v9  ;;  %852 = vmatpush3.msra.mxu0 %v517_v8 }
  0x7b   :  { %853 = vmatprep.subr.mxu0 %v1016_v9  ;;  %883 = vmatprep.mubr.msk.f32.mxu0 %vm1017_vm0, %v1016_v9 }
  0x7c   :  { %854 = vmatpush3.msra.mxu0 %v516_v10  ;;  %888 = vmatprep.mubr.msk.f32.mxu1 %vm1017_vm0, %v1016_v9 }
  0x7d   :  { %855 = vmatprep.subr.mxu0 %v1016_v9 }
  0x7e   :  { %856 = vmatpush3.msra.mxu0 %v515_v11 }
  0x7f   :  { %857 = vmatprep.subr.mxu0 %v1016_v9 }
  0x80   :  { %858 = vmatpush3.msra.mxu0 %v514_v12 }
  0x81   :  { %859 = vmatprep.subr.mxu0 %v1016_v9 }
  0x82   :  { %860 = vmatpush3.msra.mxu0 %v513_v13 }
  0x83   :  { %861 = vmatprep.subr.mxu0 %v1016_v9 }
  0x84   :  { %862 = vmatpush3.msra.mxu0 %v512_v14 }
  0x85   :  { %863 = vmatprep.subr.mxu0 %v1016_v9 }
  0x86   :  { %864 = vmatpush3.msra.mxu0 %v511_v15 }
  0x87   :  { %865 = vmatprep.subr.mxu0 %v1016_v9 }
  0x88   :  { %866 = vmatpush3.msra.mxu0 %v510_v16 }
  0x89   :  { %867 = vmatprep.subr.mxu0 %v1016_v9 }
  0x8a   :  { %868 = vmatpush3.msra.mxu0 %v509_v17 }
  0x8b   :  { %869 = vmatprep.subr.mxu0 %v1016_v9 }
  0x8c   :  { %870 = vmatpush3.msra.mxu0 %v508_v18 }
  0x8d   :  { %871 = vmatprep.subr.mxu0 %v1016_v9 }
  0x8e   :  { %872 = vmatpush3.msra.mxu0 %v507_v19 }
  0x8f   :  { %873 = vmatprep.subr.mxu0 %v1016_v9 }
  0x90   :  { %874 = vmatpush3.msra.mxu0 %v506_v20 }
  0x91   :  { %875 = vmatprep.subr.mxu0 %v1016_v9 }
  0x92   :  { %876 = vmatpush3.msra.mxu0 %v505_v21 }
  0x93   :  { %877 = vmatprep.subr.mxu0 %v1016_v9 }
  0x94   :  { %878 = vmatpush3.msra.mxu0 %v504_v22 }
  0x95   :  { %879 = vmatprep.subr.mxu0 %v1016_v9 }
  0x96   :  { %880 = vmatpush3.msra.mxu0 %v503_v23 }
  0x97   :  { %881 = vmatprep.subr.mxu0 %v1016_v9 }
  0x98   :  { %882 = vmatpush3.msra.mxu0 %v502_v24 }
 0x116   :  { %v724_v25 = vpop.f32.mrf.mxu0 }
 0x118   :  { %v759_v26 = vpop.f32.mrf.mxu1  ;;  %v725_v27 = vpop.f32.mrf.mxu0 }
 0x119   :  { %v726_v28 = vadd.f32 %v725_v27, %v724_v25 }
 0x11a   :  { %v760_v30 = vpop.f32.mrf.mxu1 }
 0x11b   :  { %v288_v31 = vadd.f32 %v726_v28, %v690_v29  ;;  %v761_v32 = vadd.f32 %v760_v30, %v759_v26 }
 0x11d   :  { %v358_v37 = vadd.f32 %v761_v32, %v288_v31 }
 0x138   :  { %v794_v33 = vpop.f32.mrf.mxu0 }
 0x139   :  { %v829_v34 = vpop.f32.mrf.mxu1 }
 0x13a   :  { %v795_v35 = vpop.f32.mrf.mxu0 }
 0x13b   :  { %v830_v36 = vpop.f32.mrf.mxu1  ;;  %v796_v38 = vadd.f32 %v795_v35, %v794_v33 }
 0x13c   :  { %v831_v40 = vadd.f32 %v830_v36, %v829_v34 }
 0x13d   :  { %v428_v39 = vadd.f32 %v796_v38, %v358_v37 }
 0x13f   :  { %v498_v41 = vadd.f32 %v831_v40, %v428_v39 }
 0x141   :  { %v501_v42 = vmul.f32 %v498_v41, %v498_v41 }
 0x143   :  { %884 = vmatmul.mubr.f32.vlgmr.msra.gmra.mxu0 %v501_v42 }
 0x203   :  { %v584_v44 = vpop.f32.mrf.mxu0 }
 0x204   :  { %v590_v45 = vmul.f32 %v589_v43, %v584_v44 }
 0x205   :  { %v885_v47 = vpop.f32.mrf.mxu0 }
 0x206   :  { %887 = vmatpush3.msra.mxu1 %v590_v45 }
 0x207   :  { %889 = vmatmul.mubr.msk.f32.vlgmr.msra.gmra.mxu1 %vm592_vm1, %v588_v46 }
 0x2c7   :  { %v662_v49 = vpop.f32.mrf.mxu1 }
 0x2c8   :  { %v663_v50 = vadd.f32 %v662_v49, %v591_v48 }
 0x2c9   :  { %v890_v51 = vpop.f32.mrf.mxu1 }
 0x2ca   :  { %900 = vrsqrt.f32 %v663_v50 }
 0x2d7   :  { %v901_v55 = vpop.eup %900 }
 0x2d8   :  { %v670_v56 = vrot.slane %v901_v55, %v669_v54 }
 0x2da   :  { %v671_v57 = vmul.f32 %v670_v56, %v498_v41 }
 0x2dc   :  { %672 = vst [vmem:[#allocation10] sm:$0xff] %v671_v57 }
 0x2dd   :  { %993 = shalt.err (!%p990_p10)
}
 0x2de   :  { %682 = dma.vmem_to_hbm [thread:$0]  %s680_s25, 128, %s1090_s7, [#allocation4]  }
 0x2df   :  { %1008 = dma.done.wait [#allocation4], 128  }
 0x2e0   :  { %1009 = vsyncadd [#allocation4], 4294967168 }
 0x2e1   :  { %686 = vsyncpa [#allocation3], 1 }
 0x2e2   :  { %687 = vsyncpa [#allocation6], 1 }
 0x2e3   :  { %688 = vsyncpa [#allocation9], 1 }
 0x2e4   :  { %689 = vsyncpa [#allocation4], 1 }

</bundles_post_ra>
